<compile_context>
chip_gen: v7x
topology: tpu7x:2x2x1
jax: 0.10.0
libtpu: 0.0.40
codegen_flags: <defaults>
</compile_context>

<pallas_src>
import math
from typing import NamedTuple

import jax
import jax.numpy as jnp
from jax.experimental import pallas as pl
from jax.experimental.pallas import tpu as pltpu


def _round_up(x, m):
    return ((x + m - 1) // m) * m


class FFNParams(NamedTuple):
    """Padded, MXU-ready FFN parameters (prepare once per layer, reuse per call)."""
    w1: jax.Array          # (D_pad, F_pad) compute dtype  == PyTorch dense1.weight.T, padded
    b1: jax.Array          # (1, F_pad)     f32
    w2: jax.Array          # (F_pad, D_pad) compute dtype  == PyTorch dense2.weight.T, padded
    b2: jax.Array          # (1, D_pad)     f32
    num_hiddens: int
    ffn_num_hiddens: int


def prepare_ffn_params(w1, b1, w2, b2, *, compute_dtype=jnp.bfloat16) -> FFNParams:
    """Pad weights to lane-dense (multiple-of-128) shapes and cast to the MXU
    compute dtype ONCE, so the per-call HBM traffic is only the kernel's own."""
    d, f = w1.shape
    assert w2.shape == (f, d) and b1.shape == (f,) and b2.shape == (d,)
    d_pad, f_pad = _round_up(d, 128), _round_up(f, 128)
    w1p = jnp.pad(w1, ((0, d_pad - d), (0, f_pad - f))).astype(compute_dtype)
    w2p = jnp.pad(w2, ((0, f_pad - f), (0, d_pad - d))).astype(compute_dtype)
    b1p = jnp.pad(b1, (0, f_pad - f)).reshape(1, f_pad).astype(jnp.float32)
    b2p = jnp.pad(b2, (0, d_pad - d)).reshape(1, d_pad).astype(jnp.float32)
    return FFNParams(w1p, b1p, w2p, b2p, d, f)


# ---------------------------------------------------------------- kernels ---

def _ffn_kernel_resident(x_ref, w1_ref, b1_ref, w2_ref, b2_ref, o_ref):
    # x:(tm,Dp) native dtype | W1:(Dp,Fp) | b1:(1,Fp) f32 | W2:(Fp,Dp) | b2:(1,Dp) f32
    x = x_ref[...].astype(w1_ref.dtype)                   # cast in-kernel, not in the wrapper
    h = jnp.dot(x, w1_ref[...], preferred_element_type=jnp.float32)
    h = jnp.maximum(h + b1_ref[...], 0.0)                 # bias + ReLU in f32 (VPU)
    y = jnp.dot(h.astype(w2_ref.dtype), w2_ref[...],
                preferred_element_type=jnp.float32)
    o_ref[...] = (y + b2_ref[...]).astype(o_ref.dtype)


def _ffn_kernel_ftiled(x_ref, w1_ref, b1_ref, w2_ref, b2_ref, o_ref, acc_ref):
    # Grid = (row tiles, F tiles); F is the trailing "arbitrary" axis,
    # accumulated into an f32 (tm, Dp) scratch so only weight slices live in VMEM.
    f = pl.program_id(1)

    @pl.when(f == 0)
    def _():
        acc_ref[...] = jnp.zeros_like(acc_ref)

    x = x_ref[...].astype(w1_ref.dtype)
    h = jnp.dot(x, w1_ref[...], preferred_element_type=jnp.float32)
    h = jnp.maximum(h + b1_ref[...], 0.0)
    acc_ref[...] += jnp.dot(h.astype(w2_ref.dtype), w2_ref[...],
                            preferred_element_type=jnp.float32)

    @pl.when(f == pl.num_programs(1) - 1)
    def _():
        o_ref[...] = (acc_ref[...] + b2_ref[...]).astype(o_ref.dtype)


# ------------------------------------------------------------- heuristics ---

def _choose_row_tiling(rows, tm_max=256):
    """Pick tm to (a) waste little row padding and (b) give >= 2 grid steps
    when there is enough work (so the parallel axis feeds both v7x cores)."""
    tm_max = max(128, tm_max)
    if rows <= tm_max:
        if rows > 128:                                   # split once for megacore
            tm = _round_up(-(-rows // 2), 16)
        else:
            tm = max(16, _round_up(rows, 16))
        return tm, _round_up(rows, tm)
    best = None
    for tm in range(128, tm_max + 1, 64):                # {128, 192, 256, ...}
        rows_pad = _round_up(rows, tm)
        waste = rows_pad - rows
        if best is None or (waste, -tm) < (best[0], -best[1]):
            best = (waste, tm, rows_pad)
    return best[1], best[2]


def _vmem_limit_bytes(*, tm, d_pad, f_block, x_itemsize, out_itemsize,
                      w_itemsize, weight_buffer_bytes, extra_scratch_bytes=0):
    io_tiles = 2 * tm * d_pad * (x_itemsize + out_itemsize)      # double-buffered x / out
    biases = 2 * (f_block + d_pad) * 4
    temps = tm * f_block * (4 + w_itemsize) + tm * d_pad * 4     # f32 h + cast copy + f32 y
    total = io_tiles + biases + temps + weight_buffer_bytes + extra_scratch_bytes
    total = int(total * 1.25) + (2 << 20)                        # headroom
    return max(32 << 20, min(total, 100 << 20))


# ---------------------------------------------------------------- wrapper ---

def position_wise_ffn(x, params: FFNParams, *, out_dtype=None, tm_max=256,
                      tf=2048, max_resident_weight_bytes=40 << 20):
    """x: (batch, seq, num_hiddens) -> (batch, seq, num_hiddens)."""
    B, S, D = x.shape
    assert D == params.num_hiddens
    d_pad, f_pad = params.w1.shape
    out_dtype = x.dtype if out_dtype is None else out_dtype

    rows = B * S
    tm, rows_pad = _choose_row_tiling(rows, tm_max)

    x2d = x.reshape(rows, D)
    if rows_pad != rows or d_pad != D:
        x2d = jnp.pad(x2d, ((0, rows_pad - rows), (0, d_pad - D)))

    x_isz = jnp.dtype(x2d.dtype).itemsize
    o_isz = jnp.dtype(out_dtype).itemsize
    w_isz = jnp.dtype(params.w1.dtype).itemsize
    weight_bytes = 2 * d_pad * f_pad * w_isz

    cost = pl.CostEstimate(
        flops=4 * rows_pad * d_pad * f_pad,
        transcendentals=0,
        bytes_accessed=(rows_pad * d_pad * (x_isz + o_isz)
                        + weight_bytes + (f_pad + d_pad) * 4))

    keep1 = pl.Buffered(1)       # single-buffer constant-index (resident) operands

    if weight_bytes <= max_resident_weight_bytes:
        # ---- resident-weight path: weights stay in VMEM across all row tiles.
        grid = (rows_pad // tm,)
        in_specs = [
            pl.BlockSpec((tm, d_pad), lambda i: (i, 0)),                          # x (pipelined)
            pl.BlockSpec((d_pad, f_pad), lambda i: (0, 0), pipeline_mode=keep1),  # W1 resident
            pl.BlockSpec((1, f_pad), lambda i: (0, 0), pipeline_mode=keep1),      # b1 resident
            pl.BlockSpec((f_pad, d_pad), lambda i: (0, 0), pipeline_mode=keep1),  # W2 resident
            pl.BlockSpec((1, d_pad), lambda i: (0, 0), pipeline_mode=keep1),      # b2 resident
        ]
        out_spec = pl.BlockSpec((tm, d_pad), lambda i: (i, 0))
        scratch = []
        kernel = _ffn_kernel_resident
        semantics = ("parallel",)
        vmem_limit = _vmem_limit_bytes(
            tm=tm, d_pad=d_pad, f_block=f_pad, x_itemsize=x_isz,
            out_itemsize=o_isz, w_itemsize=w_isz,
            weight_buffer_bytes=weight_bytes)                    # 1 buffer each
    else:
        # ---- large-F fallback: tile F on a trailing "arbitrary" grid axis.
        tf_eff = min(_round_up(tf, 128), f_pad)
        while f_pad % tf_eff:
            tf_eff -= 128
        grid = (rows_pad // tm, f_pad // tf_eff)
        in_specs = [
            pl.BlockSpec((tm, d_pad), lambda i, f: (i, 0)),      # fetched once per row tile
            pl.BlockSpec((d_pad, tf_eff), lambda i, f: (0, f)),
            pl.BlockSpec((1, tf_eff), lambda i, f: (0, f)),
            pl.BlockSpec((tf_eff, d_pad), lambda i, f: (f, 0)),
            pl.BlockSpec((1, d_pad), lambda i, f: (0, 0), pipeline_mode=keep1),
        ]
        out_spec = pl.BlockSpec((tm, d_pad), lambda i, f: (i, 0))
        scratch = [pltpu.VMEM((tm, d_pad), jnp.float32)]
        kernel = _ffn_kernel_ftiled
        semantics = ("parallel", "arbitrary")
        vmem_limit = _vmem_limit_bytes(
            tm=tm, d_pad=d_pad, f_block=tf_eff, x_itemsize=x_isz,
            out_itemsize=o_isz, w_itemsize=w_isz,
            weight_buffer_bytes=2 * 2 * d_pad * tf_eff * w_isz,  # double-buffered slices
            extra_scratch_bytes=tm * d_pad * 4)

    out2d = pl.pallas_call(
        kernel,
        out_shape=jax.ShapeDtypeStruct((rows_pad, d_pad), out_dtype),
        grid_spec=pltpu.PrefetchScalarGridSpec(
            num_scalar_prefetch=0,
            grid=grid,
            in_specs=in_specs,
            out_specs=out_spec,
            scratch_shapes=scratch,
        ),
        compiler_params=pltpu.CompilerParams(
            dimension_semantics=semantics,
            vmem_limit_bytes=vmem_limit,
        ),
        cost_estimate=cost,
    )(x2d, params.w1, params.b1, params.w2, params.b2)

    return out2d[:rows, :D].reshape(B, S, D)


def position_wise_ffn_from_weights(x, w1, b1, w2, b2, *, compute_dtype=jnp.bfloat16, **kwargs):
    """Convenience one-shot wrapper (prefer preparing params once per layer)."""
    return position_wise_ffn(
        x, prepare_ffn_params(w1, b1, w2, b2, compute_dtype=compute_dtype), **kwargs)


# ------------------------------------------------------------------- test ---

def _init_linear_params(key, in_features, out_features):
    """Deterministic init mimicking torch.nn.Linear (uniform +/- 1/sqrt(in))."""
    k_w, k_b = jax.random.split(key)
    bound = 1.0 / math.sqrt(in_features)
    # stored as (in, out) == PyTorch weight.T
    w = jax.random.uniform(k_w, (in_features, out_features), jnp.float32,
                           minval=-bound, maxval=bound)
    b = jax.random.uniform(k_b, (out_features,), jnp.float32,
                           minval=-bound, maxval=bound)
    return w, b


if __name__ == "__main__":
    batch, seq, num_hiddens, ffn_num_hiddens = 2, 8, 32, 64

    key = jax.random.PRNGKey(0)
    k_x, k_l1, k_l2, k_l3, k_l4 = jax.random.split(key, 5)

    x = jax.random.normal(k_x, (batch, seq, num_hiddens), jnp.float32)
    w1, b1 = _init_linear_params(k_l1, num_hiddens, ffn_num_hiddens)
    w2, b2 = _init_linear_params(k_l2, ffn_num_hiddens, num_hiddens)

    # Resident-weight path (weights padded/cast once, reused per call).
    params = prepare_ffn_params(w1, b1, w2, b2)
    out = jax.block_until_ready(position_wise_ffn(x, params))
    ref = jnp.maximum(x @ w1 + b1, 0.0) @ w2 + b2
    assert out.shape == (batch, seq, num_hiddens)
    assert jnp.allclose(out, ref, atol=5e-2, rtol=5e-2)

    # F-tiled accumulation path (forced; 2 F-steps) — exercises the large-F
    # fallback used when resident weights would not fit in VMEM.
    f_big = 256
    w1b, b1b = _init_linear_params(k_l3, num_hiddens, f_big)
    w2b, b2b = _init_linear_params(k_l4, f_big, num_hiddens)
    out_t = jax.block_until_ready(
        position_wise_ffn_from_weights(x, w1b, b1b, w2b, b2b,
                                       max_resident_weight_bytes=0, tf=128))
    ref_t = jnp.maximum(x @ w1b + b1b, 0.0) @ w2b + b2b
    assert out_t.shape == (batch, seq, num_hiddens)
    assert jnp.allclose(out_t, ref_t, atol=5e-2, rtol=5e-2)

    print("KERNEL_OK")
</pallas_src>

<mosaic_0001>
module attributes {stable_mosaic.version = 11 : i64} {
  func.func @_ffn_kernel_resident(%arg0: i32, %arg1: memref<16x128xf32, #tpu.memory_space<vmem>>, %arg2: memref<128x128xbf16, #tpu.memory_space<vmem>>, %arg3: memref<1x128xf32, #tpu.memory_space<vmem>>, %arg4: memref<128x128xbf16, #tpu.memory_space<vmem>>, %arg5: memref<1x128xf32, #tpu.memory_space<vmem>>, %arg6: memref<16x128xf32, #tpu.memory_space<vmem>>) attributes {dimension_semantics = [#tpu.dimension_semantics<parallel>], iteration_bounds = array<i64: 1>, scalar_prefetch = 0 : i64, scratch_operands = 0 : i64, tpu.core_type = #tpu.core_type<tc>, window_params = [{transform_indices = @transform_0, window_bounds = array<i64: 16, 128>}, {pipeline_mode = #tpu.pipeline_mode<synchronous>, transform_indices = @transform_1, window_bounds = array<i64: 128, 128>}, {pipeline_mode = #tpu.pipeline_mode<synchronous>, transform_indices = @transform_2, window_bounds = array<i64: 1, 128>}, {pipeline_mode = #tpu.pipeline_mode<synchronous>, transform_indices = @transform_3, window_bounds = array<i64: 128, 128>}, {pipeline_mode = #tpu.pipeline_mode<synchronous>, transform_indices = @transform_4, window_bounds = array<i64: 1, 128>}, {transform_indices = @transform_5, window_bounds = array<i64: 16, 128>}]} {
    %c0 = arith.constant 0 : index
    %c0_0 = arith.constant 0 : index
    %0 = vector.load %arg1[%c0, %c0_0] : memref<16x128xf32, #tpu.memory_space<vmem>>, vector<16x128xf32>
    %1 = arith.truncf %0 : vector<16x128xf32> to vector<16x128xbf16>
    %c0_1 = arith.constant 0 : index
    %c0_2 = arith.constant 0 : index
    %2 = vector.load %arg2[%c0_1, %c0_2] : memref<128x128xbf16, #tpu.memory_space<vmem>>, vector<128x128xbf16>
    %cst = arith.constant dense<0.000000e+00> : vector<16x128xf32>
    %3 = tpu.matmul %1, %2, %cst {dimension_numbers = #tpu.dot_dimension_numbers<[1], [0], [0], [1], [0, 0, 1, 1], [], []>} : vector<16x128xbf16>, vector<128x128xbf16>, vector<16x128xf32> -> vector<16x128xf32>
    %c0_3 = arith.constant 0 : index
    %c0_4 = arith.constant 0 : index
    %4 = vector.load %arg3[%c0_3, %c0_4] : memref<1x128xf32, #tpu.memory_space<vmem>>, vector<1x128xf32>
    %5 = vector.broadcast %4 : vector<1x128xf32> to vector<16x128xf32>
    %6 = arith.addf %3, %5 : vector<16x128xf32>
    %cst_5 = arith.constant 0.000000e+00 : f32
    %7 = vector.broadcast %cst_5 : f32 to vector<16x128xf32>
    %8 = arith.maximumf %6, %7 : vector<16x128xf32>
    %9 = arith.truncf %8 : vector<16x128xf32> to vector<16x128xbf16>
    %c0_6 = arith.constant 0 : index
    %c0_7 = arith.constant 0 : index
    %10 = vector.load %arg4[%c0_6, %c0_7] : memref<128x128xbf16, #tpu.memory_space<vmem>>, vector<128x128xbf16>
    %cst_8 = arith.constant dense<0.000000e+00> : vector<16x128xf32>
    %11 = tpu.matmul %9, %10, %cst_8 {dimension_numbers = #tpu.dot_dimension_numbers<[1], [0], [0], [1], [0, 0, 1, 1], [], []>} : vector<16x128xbf16>, vector<128x128xbf16>, vector<16x128xf32> -> vector<16x128xf32>
    %c0_9 = arith.constant 0 : index
    %c0_10 = arith.constant 0 : index
    %12 = vector.load %arg5[%c0_9, %c0_10] : memref<1x128xf32, #tpu.memory_space<vmem>>, vector<1x128xf32>
    %13 = vector.broadcast %12 : vector<1x128xf32> to vector<16x128xf32>
    %14 = arith.addf %11, %13 : vector<16x128xf32>
    %c0_11 = arith.constant 0 : index
    %c0_12 = arith.constant 0 : index
    %15 = vector.load %arg6[%c0_11, %c0_12] : memref<16x128xf32, #tpu.memory_space<vmem>>, vector<16x128xf32>
    tpu.vector_store %arg6[%c0_11, %c0_12], %14 {strides = array<i32>} : memref<16x128xf32, #tpu.memory_space<vmem>>, vector<16x128xf32>,
    return
  }
  func.func @transform_0(%arg0: i32) -> (i32, i32) {
    %c0_i32 = arith.constant 0 : i32
    %c0_i32_0 = arith.constant 0 : i32
    return %arg0, %c0_i32 : i32, i32
  }
  func.func @transform_1(%arg0: i32) -> (i32, i32) {
    %c0_i32 = arith.constant 0 : i32
    %c0_i32_0 = arith.constant 0 : i32
    %c0_i32_1 = arith.constant 0 : i32
    return %c0_i32, %c0_i32_0 : i32, i32
  }
  func.func @transform_2(%arg0: i32) -> (i32, i32) {
    %c0_i32 = arith.constant 0 : i32
    %c0_i32_0 = arith.constant 0 : i32
    %c0_i32_1 = arith.constant 0 : i32
    return %c0_i32, %c0_i32_0 : i32, i32
  }
  func.func @transform_3(%arg0: i32) -> (i32, i32) {
    %c0_i32 = arith.constant 0 : i32
    %c0_i32_0 = arith.constant 0 : i32
    %c0_i32_1 = arith.constant 0 : i32
    return %c0_i32, %c0_i32_0 : i32, i32
  }
  func.func @transform_4(%arg0: i32) -> (i32, i32) {
    %c0_i32 = arith.constant 0 : i32
    %c0_i32_0 = arith.constant 0 : i32
    %c0_i32_1 = arith.constant 0 : i32
    return %c0_i32, %c0_i32_0 : i32, i32
  }
  func.func @transform_5(%arg0: i32) -> (i32, i32) {
    %c0_i32 = arith.constant 0 : i32
    %c0_i32_0 = arith.constant 0 : i32
    return %arg0, %c0_i32 : i32, i32
  }
}

</mosaic_0001>

<bundles_post_ra>
// kernel: tpu_custom_call.1
= control target key start
LH: loop header
LB: loop body
LE: loop exit
PB: predicated region body
PF: predicated region fallthrough
CT: control target
= control target key end

     0   :  { %10 = vsyncpa [#allocation3], 0  ;;  %s615_s0 = inlined_call_operand.hbm [shape: f32[16,128], index: 0, kind: input, shape index: {}]   ;;  %s616_s1 = inlined_call_operand.hbm [shape: bf16[128,128], index: 1, kind: input, shape index: {}]   ;;  %s617_s2 = inlined_call_operand.vmem [shape: f32[1,128], index: 2, kind: input, shape index: {}]   ;;  %s618_s3 = inlined_call_operand.hbm [shape: bf16[128,128], index: 3, kind: input, shape index: {}]   ;;  %s619_s4 = inlined_call_operand.vmem [shape: f32[1,128], index: 4, kind: input, shape index: {}]   ;;  %s620_s5 = inlined_call_operand.hbm [shape: f32[16,128], index: 5, kind: output, shape index: {}]  }
   0x1   :  { %11 = vsyncpa [#allocation6], 0 }
   0x2   :  { %12 = vsyncpa [#allocation4], 0  ;;  %s509_s18 = smov [#allocation5]   ;;  %s415_s22 = scalar_lea.hbm %s616_s1, 1024 }
   0x3   :  { %s30_s19 = sshll.u32 %s509_s18, 4  ;;  %p416_p0 = scmp.ne.s32.totalorder %s616_s1, %s415_s22  ;;  %s31_s19 = int_to_ptr.vmem [resolvable:$true] %s30_s19 }
   0x4   :  { %p419_p1 = scmp.lt.u32.totalorder %s415_s22, %s616_s1 }
   0x6   :  { %p421_p2 = pnand %p419_p1, %p416_p0 }
   0x8   :  { %424 = shalt.err (!%p421_p2)
}
   0x9   :  { %s425_s27 = scalar_lea.vmem %s31_s19, 1024  ;;  %p430_p4 = scmp.lt.s32.totalorder %s31_s19, %s31_s19 }
   0xa   :  { %p426_p3 = scmp.ne.s32.totalorder %s31_s19, %s425_s27  ;;  %p431_p5 = scmp.lt.s32.totalorder %s425_s27, %s425_s27 }
   0xc   :  { %p432_p6 = por %p431_p5, %p430_p4 }
   0xe   :  { %p433_p7 = pnand %p432_p6, %p426_p3 }
  0x10   :  { %436 = shalt.err (!%p433_p7)
}
  0x11   :  { %s510_s28 = smov 64   ;;  %s511_s29 = smov 4  }
  0x12   :  { %36 = dma.hbm_to_vmem [thread:$0]  %s616_s1, 1024, %s31_s19, [#allocation6], %s510_s28, %s510_s28, %s511_s29  }
  0x13   :  { %s512_s7 = smov [#allocation2]   ;;  %s437_s11 = scalar_lea.hbm %s615_s0, 256 }
  0x14   :  { %s18_s8 = sshll.u32 %s512_s7, 4  ;;  %p438_p8 = scmp.ne.s32.totalorder %s615_s0, %s437_s11  ;;  %s19_s8 = int_to_ptr.vmem [resolvable:$true] %s18_s8 }
  0x15   :  { %p441_p9 = scmp.lt.u32.totalorder %s437_s11, %s615_s0 }
  0x17   :  { %p443_p10 = pnand %p441_p9, %p438_p8 }
  0x19   :  { %446 = shalt.err (!%p443_p10)
}
  0x1a   :  { %s447_s16 = scalar_lea.vmem %s19_s8, 256  ;;  %p452_p12 = scmp.lt.s32.totalorder %s19_s8, %s19_s8 }
  0x1b   :  { %p448_p11 = scmp.ne.s32.totalorder %s19_s8, %s447_s16  ;;  %p453_p13 = scmp.lt.s32.totalorder %s447_s16, %s447_s16 }
  0x1d   :  { %p454_p0 = por %p453_p13, %p452_p12 }
  0x1f   :  { %p455_p1 = pnand %p454_p0, %p448_p11 }
  0x21   :  { %458 = shalt.err (!%p455_p1)
}
  0x22   :  { %s513_s1 = smov 128   ;;  %s514_s17 = smov 8  }
  0x23   :  { %24 = dma.hbm_to_vmem [thread:$0]  %s615_s0, 256, %s19_s8, [#allocation3], %s513_s1, %s513_s1, %s514_s17  }
  0x24   :  { %s515_s20 = smov [#allocation7]   ;;  %s459_s24 = scalar_lea.hbm %s618_s3, 1024 }
  0x25   :  { %s44_s21 = sshll.u32 %s515_s20, 4  ;;  %p460_p2 = scmp.ne.s32.totalorder %s618_s3, %s459_s24  ;;  %s45_s21 = int_to_ptr.vmem [resolvable:$true] %s44_s21 }
  0x26   :  { %p463_p3 = scmp.lt.u32.totalorder %s459_s24, %s618_s3 }
  0x28   :  { %p465_p4 = pnand %p463_p3, %p460_p2 }
  0x2a   :  { %468 = shalt.err (!%p465_p4)
}
  0x2b   :  { %s469_s6 = scalar_lea.vmem %s45_s21, 1024  ;;  %p474_p6 = scmp.lt.s32.totalorder %s45_s21, %s45_s21 }
  0x2c   :  { %p470_p5 = scmp.ne.s32.totalorder %s45_s21, %s469_s6  ;;  %p475_p7 = scmp.lt.s32.totalorder %s469_s6, %s469_s6 }
  0x2e   :  { %p476_p8 = por %p475_p7, %p474_p6 }
  0x30   :  { %p477_p9 = pnand %p476_p8, %p470_p5 }
  0x32   :  { %480 = shalt.err (!%p477_p9)
}
  0x33   :  { %50 = dma.hbm_to_vmem [thread:$0]  %s618_s3, 1024, %s45_s21, [#allocation6], %s510_s28, %s510_s28, %s511_s29  }
  0x34   :  { %503 = dma.done.wait [#allocation3], 256  }
  0x35   :  { %504 = vsyncadd [#allocation3], 4294967040 }
  0x36   :  { %505 = dma.done.wait [#allocation6], 2048  }
  0x37   :  { %506 = vsyncadd [#allocation6], 4294965248  ;;  %v516_v0 = vmov 0.0   ;;  %vm517_vm0 = vmmov 0   ;;  %v399_v1 = vld [vmem:[#allocation5] sm:$0xff]   ;;  %v400_v2 = vld [vmem:[#allocation5 + $0x8] sm:$0xff]  }
  0x38   :  { %349 = vmatprep.subr.bf16.mxu0 %v516_v0  ;;  %365 = vmatprep.mubr.msk.bf16.mxu0 %vm517_vm0, %v516_v0  ;;  %v401_v3 = vld [vmem:[#allocation5 + $0x10] sm:$0xff]   ;;  %v407_v4 = vld [vmem:[#allocation7] sm:$0xff]   ;;  %v402_v5 = vld [vmem:[#allocation5 + $0x18] sm:$0xff]   ;;  %s518_s9 = smov [#allocation8]  }
  0x39   :  { %369 = vmatprep.subr.bf16.mxu1 %v516_v0  ;;  %385 = vmatprep.mubr.msk.bf16.mxu1 %vm517_vm0, %v516_v0  ;;  %v408_v6 = vld [vmem:[#allocation7 + $0x8] sm:$0xff]   ;;  %v403_v7 = vld [vmem:[#allocation5 + $0x20] sm:$0xff]   ;;  %v409_v8 = vld [vmem:[#allocation7 + $0x10] sm:$0xff]   ;;  %s300_s10 = sshll.u32 %s518_s9, 4  ;;  %s301_s10 = int_to_ptr.vmem [resolvable:$true] %s300_s10 }
  0x3a   :  { %350 = vmatpush3.bf16.msra.mxu0 %v399_v1  ;;  %370 = vmatpush3.bf16.msra.mxu1 %v407_v4  ;;  %v404_v9 = vld [vmem:[#allocation5 + $0x28] sm:$0xff]   ;;  %v410_v10 = vld [vmem:[#allocation7 + $0x18] sm:$0xff]   ;;  %v405_v11 = vld [vmem:[#allocation5 + $0x30] sm:$0xff]   ;;  %p486_p11 = scmp.lt.s32.totalorder %s301_s10, %s301_s10 }
  0x3b   :  { %351 = vmatprep.subr.bf16.mxu0 %v516_v0  ;;  %371 = vmatprep.subr.bf16.mxu1 %v516_v0  ;;  %v411_v12 = vld [vmem:[#allocation7 + $0x20] sm:$0xff]   ;;  %v406_v13 = vld [vmem:[#allocation5 + $0x38] sm:$0xff]   ;;  %v63_v14 = vld [vmem:[#allocation2] sm:$0xff] }
  0x3c   :  { %v64_v15 = vld [vmem:[#allocation2 + $0x8] sm:$0xff]  ;;  %v412_v16 = vld [vmem:[#allocation7 + $0x28] sm:$0xff]   ;;  %v413_v18 = vld [vmem:[#allocation7 + $0x30] sm:$0xff]  }
  0x3d   :  { %v65_v17 = vpack.c.bf16 %v64_v15, %v63_v14  ;;  %v414_v19 = vld [vmem:[#allocation7 + $0x38] sm:$0xff]   ;;  %v313_v20 = vld [vmem:[%s617_s2] ss:$0 sm:$0xff]  ;;  %s481_s2 = scalar_lea.vmem %s301_s10, 256 }
  0x3e   :  { %352 = vmatpush3.bf16.msra.mxu0 %v400_v2  ;;  %372 = vmatpush3.bf16.msra.mxu1 %v408_v6  ;;  %v322_v30 = vld [vmem:[%s619_s4] ss:$0 sm:$0xff]  ;;  %p482_p10 = scmp.ne.s32.totalorder %s301_s10, %s481_s2  ;;  %p487_p12 = scmp.lt.s32.totalorder %s481_s2, %s481_s2 }
  0x3f   :  { %353 = vmatprep.subr.bf16.mxu0 %v516_v0  ;;  %373 = vmatprep.subr.bf16.mxu1 %v516_v0 }
  0x40   :  { %p488_p13 = por %p487_p12, %p486_p11 }
  0x42   :  { %354 = vmatpush3.bf16.msra.mxu0 %v401_v3  ;;  %374 = vmatpush3.bf16.msra.mxu1 %v409_v8  ;;  %p489_p0 = pnand %p488_p13, %p482_p10 }
  0x43   :  { %355 = vmatprep.subr.bf16.mxu0 %v516_v0  ;;  %375 = vmatprep.subr.bf16.mxu1 %v516_v0 }
  0x46   :  { %356 = vmatpush3.bf16.msra.mxu0 %v402_v5  ;;  %376 = vmatpush3.bf16.msra.mxu1 %v410_v10 }
  0x47   :  { %357 = vmatprep.subr.bf16.mxu0 %v516_v0  ;;  %377 = vmatprep.subr.bf16.mxu1 %v516_v0 }
  0x4a   :  { %358 = vmatpush3.bf16.msra.mxu0 %v403_v7  ;;  %378 = vmatpush3.bf16.msra.mxu1 %v411_v12 }
  0x4b   :  { %359 = vmatprep.subr.bf16.mxu0 %v516_v0  ;;  %379 = vmatprep.subr.bf16.mxu1 %v516_v0 }
  0x4e   :  { %360 = vmatpush3.bf16.msra.mxu0 %v404_v9  ;;  %380 = vmatpush3.bf16.msra.mxu1 %v412_v16 }
  0x4f   :  { %361 = vmatprep.subr.bf16.mxu0 %v516_v0  ;;  %381 = vmatprep.subr.bf16.mxu1 %v516_v0 }
  0x52   :  { %362 = vmatpush3.bf16.msra.mxu0 %v405_v11  ;;  %382 = vmatpush3.bf16.msra.mxu1 %v413_v18 }
  0x53   :  { %363 = vmatprep.subr.bf16.mxu0 %v516_v0  ;;  %383 = vmatprep.subr.bf16.mxu1 %v516_v0 }
  0x56   :  { %364 = vmatpush3.bf16.msra.mxu0 %v406_v13  ;;  %384 = vmatpush3.bf16.msra.mxu1 %v414_v19 }
  0x59   :  { %366 = vmatmul.mubr.bf16.vlgmr.msra.gmra.mrb[0].mxu0 %v65_v17 }
 0x12c   :  { %v171_v21 = vpop.f32.mrb[0].mxu0 }
 0x12d   :  { %v172_v22 = vadd.f32 %v313_v20, %v171_v21  ;;  %v367_v23 = vpop.f32.mrb[1].mxu0 }
 0x12e   :  { %v174_v24 = vpop.f32.mrb[2].mxu0 }
 0x12f   :  { %v175_v25 = vadd.f32 %v313_v20, %v174_v24  ;;  %v368_v26 = vpop.f32.mrb[3].mxu0  ;;  %v178_v27 = vmax.f32 %v172_v22, 0.0 }
 0x131   :  { %v179_v28 = vmax.f32 %v175_v25, 0.0 }
 0x133   :  { %v180_v29 = vpack.c.bf16 %v179_v28, %v178_v27 }
 0x135   :  { %386 = vmatmul.mubr.bf16.vlgmr.msra.gmra.mrb[0].mxu1 %v180_v29 }
 0x208   :  { %v286_v31 = vpop.f32.mrb[0].mxu1 }
 0x209   :  { %v287_v32 = vadd.f32 %v322_v30, %v286_v31  ;;  %v387_v33 = vpop.f32.mrb[1].mxu1 }
 0x20a   :  { %v289_v34 = vpop.f32.mrb[2].mxu1 }
 0x20b   :  { %293 = vst [vmem:[#allocation8] sm:$0xff] %v287_v32  ;;  %v290_v35 = vadd.f32 %v322_v30, %v289_v34  ;;  %v388_v36 = vpop.f32.mrb[3].mxu1 }
 0x20d   :  { %294 = vst [vmem:[#allocation8 + $0x8] sm:$0xff] %v290_v35 }
 0x20e   :  { %492 = shalt.err (!%p489_p0)
}
 0x20f   :  { %s493_s12 = scalar_lea.hbm %s620_s5, 256 }
 0x210   :  { %p494_p1 = scmp.ne.s32.totalorder %s620_s5, %s493_s12  ;;  %p497_p2 = scmp.lt.u32.totalorder %s493_s12, %s620_s5 }
 0x212   :  { %p499_p3 = pnand %p497_p2, %p494_p1 }
 0x214   :  { %502 = shalt.err (!%p499_p3)
}
 0x215   :  { %306 = dma.vmem_to_hbm [thread:$0]  %s301_s10, 256, %s620_s5, [#allocation4], %s513_s1, %s513_s1, %s514_s17  }
 0x216   :  { %507 = dma.done.wait [#allocation4], 256  }
 0x217   :  { %508 = vsyncadd [#allocation4], 4294967040 }
 0x218   :  { %310 = vsyncpa [#allocation3], 1 }
 0x219   :  { %311 = vsyncpa [#allocation6], 1 }
 0x21a   :  { %312 = vsyncpa [#allocation4], 1 }

</bundles_post_ra>
